<compile_context>
chip_gen: v6e
topology: v6e:2x2x1
jax: 0.10.0
libtpu: 0.0.40
codegen_flags: <defaults>
</compile_context>

<pallas_src>
import functools
import math

import jax
import jax.numpy as jnp
from jax import lax
from jax.experimental import pallas as pl
from jax.experimental.pallas import tpu as pltpu

_EPS = 1e-7


def _round_up(x, m):
    return ((x + m - 1) // m) * m


def _atan_f32(x):
    # float32-accurate arctan (Cephes atanf range reduction + minimax poly).
    # lax.atan lowering is not guaranteed in Mosaic; divides use approx EUP reciprocal.
    ax = jnp.abs(x)
    big = ax > 2.414213562373095                    # tan(3*pi/8)
    mid = jnp.logical_and(ax > 0.4142135623730950,  # tan(pi/8)
                          jnp.logical_not(big))
    inv_big = pl.reciprocal(ax + 1e-30, approx=True)
    inv_mid = pl.reciprocal(ax + 1.0, approx=True)
    xr = jnp.where(big, -inv_big, jnp.where(mid, (ax - 1.0) * inv_mid, ax))
    y0 = jnp.where(big, jnp.float32(math.pi / 2),
                   jnp.where(mid, jnp.float32(math.pi / 4), jnp.float32(0.0)))
    z = xr * xr
    poly = ((8.05374449538e-2 * z - 1.38776856032e-1) * z
            + 1.99777106478e-1) * z - 3.33329491539e-1
    y = y0 + (poly * z * xr + xr)
    return jnp.where(x < 0, -y, y)


def _bce_with_logits(x, t):
    # Matches torch.nn.functional.binary_cross_entropy_with_logits (stable form).
    return jnp.maximum(x, 0.0) - x * t + jnp.log(1.0 + jnp.exp(-jnp.abs(x)))


def _detection_loss_kernel(p_ref, t_ref, out_ref, *, num_classes, tile_rows, bn):
    f32 = jnp.float32

    # Dense [tile_rows, 128] per-channel loads (upcast bf16 -> f32 if needed).
    gcx = t_ref[0].astype(f32)
    gcy = t_ref[1].astype(f32)
    gw = t_ref[2].astype(f32)
    gh = t_ref[3].astype(f32)
    gt_cls = t_ref[4].astype(f32)

    pcx = p_ref[0].astype(f32)
    pcy = p_ref[1].astype(f32)
    pw = p_ref[2].astype(f32)
    ph = p_ref[3].astype(f32)
    obj_logit = p_ref[4].astype(f32)

    # Validity mask for anchors padded up to a multiple of tile_rows*128.
    row = lax.broadcasted_iota(jnp.int32, (tile_rows, 128), 0)
    lane = lax.broadcasted_iota(jnp.int32, (tile_rows, 128), 1)
    flat_idx = (pl.program_id(0) * tile_rows + row) * 128 + lane
    valid = (flat_idx < bn).astype(f32)

    # ---------------- CIoU box loss ----------------
    gx1 = gcx - gw * 0.5
    gy1 = gcy - gh * 0.5
    gx2 = gcx + gw * 0.5
    gy2 = gcy + gh * 0.5
    px1 = pcx - pw * 0.5
    py1 = pcy - ph * 0.5
    px2 = pcx + pw * 0.5
    py2 = pcy + ph * 0.5

    inter = (jnp.maximum(jnp.minimum(gx2, px2) - jnp.maximum(gx1, px1) + 1.0, 0.0) *
             jnp.maximum(jnp.minimum(gy2, py2) - jnp.maximum(gy1, py1) + 1.0, 0.0))
    g_area = jnp.abs(gx2 - gx1 + 1.0) * jnp.abs(gy2 - gy1 + 1.0)
    p_area = jnp.abs(px2 - px1 + 1.0) * jnp.abs(py2 - py1 + 1.0)
    iou = inter * pl.reciprocal(g_area + p_area - inter + _EPS, approx=True)

    # Squared center distance / squared enclosing diagonal (no sqrt needed:
    # the reference only ever uses c**2 and d**2).
    c2 = (gcx - pcx) ** 2 + (gcy - pcy) ** 2
    ex = jnp.minimum(gx1, px1) - jnp.maximum(gx2, px2)
    ey = jnp.minimum(gy1, py1) - jnp.maximum(gy2, py2)
    d2 = ex * ex + ey * ey

    atan_gt = _atan_f32(gw * pl.reciprocal(gh + _EPS, approx=True))
    atan_pr = _atan_f32(pw * pl.reciprocal(ph + _EPS, approx=True))
    v = (4.0 / (math.pi ** 2)) * (atan_gt - atan_pr) ** 2
    alpha = v * pl.reciprocal(1.0 - iou + v + _EPS, approx=True)

    ciou_elem = (1.0 - iou + c2 * pl.reciprocal(d2 + _EPS, approx=True)
                 + alpha * v) * valid

    # ---------------- objectness loss ----------------
    obj_t = jnp.where(gt_cls > 0.0, 1.0, 0.0)     # padded anchors -> 0, so obj_elem is
    obj_elem = _bce_with_logits(obj_logit, obj_t) * obj_t   # already zero there.

    # ---------------- classification loss ----------------
    gcls_int = jnp.floor(jnp.maximum(gt_cls, 0.0)).astype(jnp.int32)
    cls_bce = jnp.zeros((tile_rows, 128), f32)
    for c in range(num_classes):                  # small unrolled loop, all 2-D vreg math
        logit_c = p_ref[5 + c].astype(f32)
        t_c = jnp.where(gcls_int == (c + 1), 1.0, 0.0)   # one_hot(nc+1)[..., 1:]
        cls_bce = cls_bce + _bce_with_logits(logit_c, t_c)
    cls_bce = cls_bce * valid
    neg = jnp.where(gcls_int <= 0, valid, 0.0)    # target_mask = (gt_cls <= 0)

    # ---------------- fused per-tile, per-lane partial sums ----------------
    parts = jnp.concatenate(
        [jnp.sum(ciou_elem, axis=0, keepdims=True),
         jnp.sum(obj_elem, axis=0, keepdims=True),
         jnp.sum(cls_bce, axis=0, keepdims=True),
         jnp.sum(neg, axis=0, keepdims=True)],
        axis=0)                                   # [4, 128] lane-dense output
    out_ref[0] = parts


def detection_loss(preds, targets, num_classes=2, weight_lst=(1.0, 1.0, 1.0),
                   tile_anchors=16384):
    """preds: [B, N, 5 + num_classes], targets: [B, N, 5] (cx, cy, w, h, class_id)."""
    B, N, C = preds.shape
    assert C == 5 + num_classes
    assert targets.shape == (B, N, 5)
    bn = B * N

    # Keep f32/bf16 as-is (bf16 path halves HBM bytes; compute is f32 in-kernel).
    def _norm(x):
        return x if x.dtype in (jnp.float32, jnp.bfloat16) else x.astype(jnp.float32)

    preds = _norm(preds)
    targets = _norm(targets)

    # Tiling: 128 anchors per lane-row; tile_rows sublane-rows per grid step.
    rows_needed = -(-bn // 128)
    tile_rows = min(max(tile_anchors // 128, 16), _round_up(rows_needed, 16))
    tile_rows = _round_up(tile_rows, 16)
    rows = _round_up(rows_needed, tile_rows)
    bn_pad = rows * 128
    num_tiles = rows // tile_rows

    # Channel-major, lane-dense layout: (C, rows, 128).
    # TODO(synk): if the producer can emit channel-major (C, rows, 128) directly,
    # this pad+transpose (one extra HBM pass over small tensors) disappears.
    def _to_channel_major(x):
        c = x.shape[2]
        flat = x.reshape(bn, c)
        if bn_pad != bn:
            flat = jnp.pad(flat, ((0, bn_pad - bn), (0, 0)))
        return jnp.transpose(flat, (1, 0)).reshape(c, rows, 128)

    p_cm = _to_channel_major(preds)
    t_cm = _to_channel_major(targets)

    kernel = functools.partial(
        _detection_loss_kernel,
        num_classes=num_classes, tile_rows=tile_rows, bn=bn)

    cost = pl.CostEstimate(
        flops=bn_pad * (140 + 12 * num_classes),
        transcendentals=bn_pad * (10 + 2 * num_classes),
        bytes_accessed=int(C * bn_pad * jnp.dtype(preds.dtype).itemsize
                           + 5 * bn_pad * jnp.dtype(targets.dtype).itemsize
                           + num_tiles * 4 * 128 * 4))

    partials = pl.pallas_call(
        kernel,
        out_shape=jax.ShapeDtypeStruct((num_tiles, 4, 128), jnp.float32),
        grid=(num_tiles,),
        in_specs=[pl.BlockSpec((C, tile_rows, 128), lambda i: (0, i, 0)),
                  pl.BlockSpec((5, tile_rows, 128), lambda i: (0, i, 0))],
        out_specs=pl.BlockSpec((1, 4, 128), lambda i: (i, 0, 0)),
        compiler_params=pltpu.CompilerParams(dimension_semantics=("parallel",)),
        cost_estimate=cost,
    )(p_cm, t_cm)

    # Tiny finalize in JAX: one divide per term, weighted total.
    sums = jnp.sum(partials, axis=(0, 2))                       # [4]
    inv_bn = jnp.float32(1.0 / bn)
    box_loss = sums[0] * inv_bn
    obj_loss = sums[1] * inv_bn                                  # mean over ALL anchors
    cls_bce_mean = sums[2] * jnp.float32(1.0 / (bn * num_classes))
    neg_frac = sums[3] * inv_bn
    cls_loss = cls_bce_mean * neg_frac                           # product of means (as in ref)
    total = (float(weight_lst[0]) * box_loss
             + float(weight_lst[1]) * obj_loss
             + float(weight_lst[2]) * cls_loss)
    return {'total': total, 'ciou': box_loss, 'obj': obj_loss, 'cls': cls_loss}


if __name__ == "__main__":
    key = jax.random.PRNGKey(0)
    k1, k2, k3 = jax.random.split(key, 3)

    B, N, NUM_CLASSES = 2, 64, 2
    preds = jax.random.normal(k1, (B, N, 5 + NUM_CLASSES), dtype=jnp.float32)
    loc_targets = 4.0 + 2.0 * jax.random.normal(k2, (B, N, 4), dtype=jnp.float32)
    cls_targets = jax.random.randint(k3, (B, N, 1), 0, NUM_CLASSES + 1).astype(jnp.float32)
    targets = jnp.concatenate([loc_targets, cls_targets], axis=-1)

    losses = detection_loss(preds, targets, num_classes=NUM_CLASSES,
                            weight_lst=(1.0, 1.0, 1.0))
    jax.block_until_ready(losses)

    vals = jnp.stack([losses['total'], losses['ciou'], losses['obj'], losses['cls']])
    assert bool(jnp.all(jnp.isfinite(vals)))
    print("KERNEL_OK")
</pallas_src>

<mosaic_0001>
module attributes {stable_mosaic.version = 11 : i64} {
  func.func @_detection_loss_kernel(%arg0: i32, %arg1: memref<7x16x128xf32, #tpu.memory_space<vmem>>, %arg2: memref<5x16x128xf32, #tpu.memory_space<vmem>>, %arg3: memref<1x4x128xf32, #tpu.memory_space<vmem>>) attributes {dimension_semantics = [#tpu.dimension_semantics<parallel>], iteration_bounds = array<i64: 1>, scalar_prefetch = 0 : i64, scratch_operands = 0 : i64, tpu.core_type = #tpu.core_type<tc>, window_params = [{transform_indices = @transform_0, window_bounds = array<i64: 7, 16, 128>}, {transform_indices = @transform_1, window_bounds = array<i64: 5, 16, 128>}, {transform_indices = @transform_2, window_bounds = array<i64: 1, 4, 128>}]} {
    %c0 = arith.constant 0 : index
    %c0_0 = arith.constant 0 : index
    %c0_1 = arith.constant 0 : index
    %0 = vector.load %arg2[%c0, %c0_0, %c0_1] : memref<5x16x128xf32, #tpu.memory_space<vmem>>, vector<1x16x128xf32>
    %1 = vector.shape_cast %0 : vector<1x16x128xf32> to vector<16x128xf32>
    %c1 = arith.constant 1 : index
    %c0_2 = arith.constant 0 : index
    %c0_3 = arith.constant 0 : index
    %2 = vector.load %arg2[%c1, %c0_2, %c0_3] : memref<5x16x128xf32, #tpu.memory_space<vmem>>, vector<1x16x128xf32>
    %3 = vector.shape_cast %2 : vector<1x16x128xf32> to vector<16x128xf32>
    %c2 = arith.constant 2 : index
    %c0_4 = arith.constant 0 : index
    %c0_5 = arith.constant 0 : index
    %4 = vector.load %arg2[%c2, %c0_4, %c0_5] : memref<5x16x128xf32, #tpu.memory_space<vmem>>, vector<1x16x128xf32>
    %5 = vector.shape_cast %4 : vector<1x16x128xf32> to vector<16x128xf32>
    %c3 = arith.constant 3 : index
    %c0_6 = arith.constant 0 : index
    %c0_7 = arith.constant 0 : index
    %6 = vector.load %arg2[%c3, %c0_6, %c0_7] : memref<5x16x128xf32, #tpu.memory_space<vmem>>, vector<1x16x128xf32>
    %7 = vector.shape_cast %6 : vector<1x16x128xf32> to vector<16x128xf32>
    %c4 = arith.constant 4 : index
    %c0_8 = arith.constant 0 : index
    %c0_9 = arith.constant 0 : index
    %8 = vector.load %arg2[%c4, %c0_8, %c0_9] : memref<5x16x128xf32, #tpu.memory_space<vmem>>, vector<1x16x128xf32>
    %9 = vector.shape_cast %8 : vector<1x16x128xf32> to vector<16x128xf32>
    %c0_10 = arith.constant 0 : index
    %c0_11 = arith.constant 0 : index
    %c0_12 = arith.constant 0 : index
    %10 = vector.load %arg1[%c0_10, %c0_11, %c0_12] : memref<7x16x128xf32, #tpu.memory_space<vmem>>, vector<1x16x128xf32>
    %11 = vector.shape_cast %10 : vector<1x16x128xf32> to vector<16x128xf32>
    %c1_13 = arith.constant 1 : index
    %c0_14 = arith.constant 0 : index
    %c0_15 = arith.constant 0 : index
    %12 = vector.load %arg1[%c1_13, %c0_14, %c0_15] : memref<7x16x128xf32, #tpu.memory_space<vmem>>, vector<1x16x128xf32>
    %13 = vector.shape_cast %12 : vector<1x16x128xf32> to vector<16x128xf32>
    %c2_16 = arith.constant 2 : index
    %c0_17 = arith.constant 0 : index
    %c0_18 = arith.constant 0 : index
    %14 = vector.load %arg1[%c2_16, %c0_17, %c0_18] : memref<7x16x128xf32, #tpu.memory_space<vmem>>, vector<1x16x128xf32>
    %15 = vector.shape_cast %14 : vector<1x16x128xf32> to vector<16x128xf32>
    %c3_19 = arith.constant 3 : index
    %c0_20 = arith.constant 0 : index
    %c0_21 = arith.constant 0 : index
    %16 = vector.load %arg1[%c3_19, %c0_20, %c0_21] : memref<7x16x128xf32, #tpu.memory_space<vmem>>, vector<1x16x128xf32>
    %17 = vector.shape_cast %16 : vector<1x16x128xf32> to vector<16x128xf32>
    %c4_22 = arith.constant 4 : index
    %c0_23 = arith.constant 0 : index
    %c0_24 = arith.constant 0 : index
    %18 = vector.load %arg1[%c4_22, %c0_23, %c0_24] : memref<7x16x128xf32, #tpu.memory_space<vmem>>, vector<1x16x128xf32>
    %19 = vector.shape_cast %18 : vector<1x16x128xf32> to vector<16x128xf32>
    %20 = tpu.iota {dimensions = array<i32: 0>} : vector<16x128xi32>
    %21 = tpu.iota {dimensions = array<i32: 1>} : vector<16x128xi32>
    %c16_i32 = arith.constant 16 : i32
    %22 = arith.muli %arg0, %c16_i32 : i32
    %23 = vector.broadcast %22 : i32 to vector<16x128xi32>
    %24 = arith.addi %23, %20 : vector<16x128xi32>
    %c128_i32 = arith.constant 128 : i32
    %25 = vector.broadcast %c128_i32 : i32 to vector<16x128xi32>
    %26 = arith.muli %24, %25 : vector<16x128xi32>
    %27 = arith.addi %26, %21 : vector<16x128xi32>
    %c128_i32_25 = arith.constant 128 : i32
    %28 = vector.broadcast %c128_i32_25 : i32 to vector<16x128xi32>
    %29 = arith.cmpi slt, %27, %28 : vector<16x128xi32>
    %30 = arith.extui %29 : vector<16x128xi1> to vector<16x128xi32>
    %31 = arith.sitofp %30 : vector<16x128xi32> to vector<16x128xf32>
    %cst = arith.constant 5.000000e-01 : f32
    %32 = vector.broadcast %cst : f32 to vector<16x128xf32>
    %33 = arith.mulf %5, %32 : vector<16x128xf32>
    %34 = arith.subf %1, %33 : vector<16x128xf32>
    %cst_26 = arith.constant 5.000000e-01 : f32
    %35 = vector.broadcast %cst_26 : f32 to vector<16x128xf32>
    %36 = arith.mulf %7, %35 : vector<16x128xf32>
    %37 = arith.subf %3, %36 : vector<16x128xf32>
    %cst_27 = arith.constant 5.000000e-01 : f32
    %38 = vector.broadcast %cst_27 : f32 to vector<16x128xf32>
    %39 = arith.mulf %5, %38 : vector<16x128xf32>
    %40 = arith.addf %1, %39 : vector<16x128xf32>
    %cst_28 = arith.constant 5.000000e-01 : f32
    %41 = vector.broadcast %cst_28 : f32 to vector<16x128xf32>
    %42 = arith.mulf %7, %41 : vector<16x128xf32>
    %43 = arith.addf %3, %42 : vector<16x128xf32>
    %cst_29 = arith.constant 5.000000e-01 : f32
    %44 = vector.broadcast %cst_29 : f32 to vector<16x128xf32>
    %45 = arith.mulf %15, %44 : vector<16x128xf32>
    %46 = arith.subf %11, %45 : vector<16x128xf32>
    %cst_30 = arith.constant 5.000000e-01 : f32
    %47 = vector.broadcast %cst_30 : f32 to vector<16x128xf32>
    %48 = arith.mulf %17, %47 : vector<16x128xf32>
    %49 = arith.subf %13, %48 : vector<16x128xf32>
    %cst_31 = arith.constant 5.000000e-01 : f32
    %50 = vector.broadcast %cst_31 : f32 to vector<16x128xf32>
    %51 = arith.mulf %15, %50 : vector<16x128xf32>
    %52 = arith.addf %11, %51 : vector<16x128xf32>
    %cst_32 = arith.constant 5.000000e-01 : f32
    %53 = vector.broadcast %cst_32 : f32 to vector<16x128xf32>
    %54 = arith.mulf %17, %53 : vector<16x128xf32>
    %55 = arith.addf %13, %54 : vector<16x128xf32>
    %56 = arith.minimumf %40, %52 : vector<16x128xf32>
    %57 = arith.maximumf %34, %46 : vector<16x128xf32>
    %58 = arith.subf %56, %57 : vector<16x128xf32>
    %cst_33 = arith.constant 1.000000e+00 : f32
    %59 = vector.broadcast %cst_33 : f32 to vector<16x128xf32>
    %60 = arith.addf %58, %59 : vector<16x128xf32>
    %cst_34 = arith.constant 0.000000e+00 : f32
    %61 = vector.broadcast %cst_34 : f32 to vector<16x128xf32>
    %62 = arith.maximumf %60, %61 : vector<16x128xf32>
    %63 = arith.minimumf %43, %55 : vector<16x128xf32>
    %64 = arith.maximumf %37, %49 : vector<16x128xf32>
    %65 = arith.subf %63, %64 : vector<16x128xf32>
    %cst_35 = arith.constant 1.000000e+00 : f32
    %66 = vector.broadcast %cst_35 : f32 to vector<16x128xf32>
    %67 = arith.addf %65, %66 : vector<16x128xf32>
    %cst_36 = arith.constant 0.000000e+00 : f32
    %68 = vector.broadcast %cst_36 : f32 to vector<16x128xf32>
    %69 = arith.maximumf %67, %68 : vector<16x128xf32>
    %70 = arith.mulf %62, %69 : vector<16x128xf32>
    %71 = arith.subf %40, %34 : vector<16x128xf32>
    %cst_37 = arith.constant 1.000000e+00 : f32
    %72 = vector.broadcast %cst_37 : f32 to vector<16x128xf32>
    %73 = arith.addf %71, %72 : vector<16x128xf32>
    %74 = math.absf %73 : vector<16x128xf32>
    %75 = arith.subf %43, %37 : vector<16x128xf32>
    %cst_38 = arith.constant 1.000000e+00 : f32
    %76 = vector.broadcast %cst_38 : f32 to vector<16x128xf32>
    %77 = arith.addf %75, %76 : vector<16x128xf32>
    %78 = math.absf %77 : vector<16x128xf32>
    %79 = arith.mulf %74, %78 : vector<16x128xf32>
    %80 = arith.subf %52, %46 : vector<16x128xf32>
    %cst_39 = arith.constant 1.000000e+00 : f32
    %81 = vector.broadcast %cst_39 : f32 to vector<16x128xf32>
    %82 = arith.addf %80, %81 : vector<16x128xf32>
    %83 = math.absf %82 : vector<16x128xf32>
    %84 = arith.subf %55, %49 : vector<16x128xf32>
    %cst_40 = arith.constant 1.000000e+00 : f32
    %85 = vector.broadcast %cst_40 : f32 to vector<16x128xf32>
    %86 = arith.addf %84, %85 : vector<16x128xf32>
    %87 = math.absf %86 : vector<16x128xf32>
    %88 = arith.mulf %83, %87 : vector<16x128xf32>
    %89 = arith.addf %79, %88 : vector<16x128xf32>
    %90 = arith.subf %89, %70 : vector<16x128xf32>
    %cst_41 = arith.constant 1.000000e-07 : f32
    %91 = vector.broadcast %cst_41 : f32 to vector<16x128xf32>
    %92 = arith.addf %90, %91 : vector<16x128xf32>
    %93 = tpu.reciprocal %92 {approx = true} : vector<16x128xf32> -> vector<16x128xf32>
    %94 = arith.mulf %70, %93 : vector<16x128xf32>
    %95 = arith.subf %1, %11 : vector<16x128xf32>
    %96 = arith.mulf %95, %95 : vector<16x128xf32>
    %97 = arith.subf %3, %13 : vector<16x128xf32>
    %98 = arith.mulf %97, %97 : vector<16x128xf32>
    %99 = arith.addf %96, %98 : vector<16x128xf32>
    %100 = arith.minimumf %34, %46 : vector<16x128xf32>
    %101 = arith.maximumf %40, %52 : vector<16x128xf32>
    %102 = arith.subf %100, %101 : vector<16x128xf32>
    %103 = arith.minimumf %37, %49 : vector<16x128xf32>
    %104 = arith.maximumf %43, %55 : vector<16x128xf32>
    %105 = arith.subf %103, %104 : vector<16x128xf32>
    %106 = arith.mulf %102, %102 : vector<16x128xf32>
    %107 = arith.mulf %105, %105 : vector<16x128xf32>
    %108 = arith.addf %106, %107 : vector<16x128xf32>
    %cst_42 = arith.constant 1.000000e-07 : f32
    %109 = vector.broadcast %cst_42 : f32 to vector<16x128xf32>
    %110 = arith.addf %7, %109 : vector<16x128xf32>
    %111 = tpu.reciprocal %110 {approx = true} : vector<16x128xf32> -> vector<16x128xf32>
    %112 = arith.mulf %5, %111 : vector<16x128xf32>
    %113 = math.absf %112 : vector<16x128xf32>
    %cst_43 = arith.constant 2.41421366 : f32
    %114 = vector.broadcast %cst_43 : f32 to vector<16x128xf32>
    %115 = arith.cmpf ogt, %113, %114 : vector<16x128xf32>
    %cst_44 = arith.constant 0.414213568 : f32
    %116 = vector.broadcast %cst_44 : f32 to vector<16x128xf32>
    %117 = arith.cmpf ogt, %113, %116 : vector<16x128xf32>
    %cst_45 = arith.constant dense<true> : vector<16x128xi1>
    %118 = arith.xori %115, %cst_45 : vector<16x128xi1>
    %119 = arith.andi %117, %118 : vector<16x128xi1>
    %cst_46 = arith.constant 1.000000e-30 : f32
    %120 = vector.broadcast %cst_46 : f32 to vector<16x128xf32>
    %121 = arith.addf %113, %120 : vector<16x128xf32>
    %122 = tpu.reciprocal %121 {approx = true} : vector<16x128xf32> -> vector<16x128xf32>
    %cst_47 = arith.constant 1.000000e+00 : f32
    %123 = vector.broadcast %cst_47 : f32 to vector<16x128xf32>
    %124 = arith.addf %113, %123 : vector<16x128xf32>
    %125 = tpu.reciprocal %124 {approx = true} : vector<16x128xf32> -> vector<16x128xf32>
    %cst_48 = arith.constant 0.000000e+00 : f32
    %126 = vector.broadcast %cst_48 : f32 to vector<16x128xf32>
    %127 = arith.subf %126, %122 : vector<16x128xf32>
    %cst_49 = arith.constant 1.000000e+00 : f32
    %128 = vector.broadcast %cst_49 : f32 to vector<16x128xf32>
    %129 = arith.subf %113, %128 : vector<16x128xf32>
    %130 = arith.mulf %129, %125 : vector<16x128xf32>
    %131 = arith.select %119, %130, %113 : vector<16x128xi1>, vector<16x128xf32>
    %132 = arith.select %115, %127, %131 : vector<16x128xi1>, vector<16x128xf32>
    %cst_50 = arith.constant 0.785398185 : f32
    %cst_51 = arith.constant 0.000000e+00 : f32
    %133 = vector.broadcast %cst_50 : f32 to vector<16x128xf32>
    %134 = vector.broadcast %cst_51 : f32 to vector<16x128xf32>
    %135 = arith.select %119, %133, %134 : vector<16x128xi1>, vector<16x128xf32>
    %cst_52 = arith.constant 1.57079637 : f32
    %136 = vector.broadcast %cst_52 : f32 to vector<16x128xf32>
    %137 = arith.select %115, %136, %135 : vector<16x128xi1>, vector<16x128xf32>
    %138 = arith.mulf %132, %132 : vector<16x128xf32>
    %cst_53 = arith.constant 0.0805374458 : f32
    %139 = vector.broadcast %cst_53 : f32 to vector<16x128xf32>
    %140 = arith.mulf %139, %138 : vector<16x128xf32>
    %cst_54 = arith.constant 0.138776854 : f32
    %141 = vector.broadcast %cst_54 : f32 to vector<16x128xf32>
    %142 = arith.subf %140, %141 : vector<16x128xf32>
    %143 = arith.mulf %142, %138 : vector<16x128xf32>
    %cst_55 = arith.constant 0.199777111 : f32
    %144 = vector.broadcast %cst_55 : f32 to vector<16x128xf32>
    %145 = arith.addf %143, %144 : vector<16x128xf32>
    %146 = arith.mulf %145, %138 : vector<16x128xf32>
    %cst_56 = arith.constant 0.333329499 : f32
    %147 = vector.broadcast %cst_56 : f32 to vector<16x128xf32>
    %148 = arith.subf %146, %147 : vector<16x128xf32>
    %149 = arith.mulf %148, %138 : vector<16x128xf32>
    %150 = arith.mulf %149, %132 : vector<16x128xf32>
    %151 = arith.addf %150, %132 : vector<16x128xf32>
    %152 = arith.addf %137, %151 : vector<16x128xf32>
    %cst_57 = arith.constant 0.000000e+00 : f32
    %153 = vector.broadcast %cst_57 : f32 to vector<16x128xf32>
    %154 = arith.cmpf olt, %112, %153 : vector<16x128xf32>
    %cst_58 = arith.constant 0.000000e+00 : f32
    %155 = vector.broadcast %cst_58 : f32 to vector<16x128xf32>
    %156 = arith.subf %155, %152 : vector<16x128xf32>
    %157 = arith.select %154, %156, %152 : vector<16x128xi1>, vector<16x128xf32>
    %cst_59 = arith.constant 1.000000e-07 : f32
    %158 = vector.broadcast %cst_59 : f32 to vector<16x128xf32>
    %159 = arith.addf %17, %158 : vector<16x128xf32>
    %160 = tpu.reciprocal %159 {approx = true} : vector<16x128xf32> -> vector<16x128xf32>
    %161 = arith.mulf %15, %160 : vector<16x128xf32>
    %162 = math.absf %161 : vector<16x128xf32>
    %cst_60 = arith.constant 2.41421366 : f32
    %163 = vector.broadcast %cst_60 : f32 to vector<16x128xf32>
    %164 = arith.cmpf ogt, %162, %163 : vector<16x128xf32>
    %cst_61 = arith.constant 0.414213568 : f32
    %165 = vector.broadcast %cst_61 : f32 to vector<16x128xf32>
    %166 = arith.cmpf ogt, %162, %165 : vector<16x128xf32>
    %cst_62 = arith.constant dense<true> : vector<16x128xi1>
    %167 = arith.xori %164, %cst_62 : vector<16x128xi1>
    %168 = arith.andi %166, %167 : vector<16x128xi1>
    %cst_63 = arith.constant 1.000000e-30 : f32
    %169 = vector.broadcast %cst_63 : f32 to vector<16x128xf32>
    %170 = arith.addf %162, %169 : vector<16x128xf32>
    %171 = tpu.reciprocal %170 {approx = true} : vector<16x128xf32> -> vector<16x128xf32>
    %cst_64 = arith.constant 1.000000e+00 : f32
    %172 = vector.broadcast %cst_64 : f32 to vector<16x128xf32>
    %173 = arith.addf %162, %172 : vector<16x128xf32>
    %174 = tpu.reciprocal %173 {approx = true} : vector<16x128xf32> -> vector<16x128xf32>
    %cst_65 = arith.constant 0.000000e+00 : f32
    %175 = vector.broadcast %cst_65 : f32 to vector<16x128xf32>
    %176 = arith.subf %175, %171 : vector<16x128xf32>
    %cst_66 = arith.constant 1.000000e+00 : f32
    %177 = vector.broadcast %cst_66 : f32 to vector<16x128xf32>
    %178 = arith.subf %162, %177 : vector<16x128xf32>
    %179 = arith.mulf %178, %174 : vector<16x128xf32>
    %180 = arith.select %168, %179, %162 : vector<16x128xi1>, vector<16x128xf32>
    %181 = arith.select %164, %176, %180 : vector<16x128xi1>, vector<16x128xf32>
    %cst_67 = arith.constant 0.785398185 : f32
    %cst_68 = arith.constant 0.000000e+00 : f32
    %182 = vector.broadcast %cst_67 : f32 to vector<16x128xf32>
    %183 = vector.broadcast %cst_68 : f32 to vector<16x128xf32>
    %184 = arith.select %168, %182, %183 : vector<16x128xi1>, vector<16x128xf32>
    %cst_69 = arith.constant 1.57079637 : f32
    %185 = vector.broadcast %cst_69 : f32 to vector<16x128xf32>
    %186 = arith.select %164, %185, %184 : vector<16x128xi1>, vector<16x128xf32>
    %187 = arith.mulf %181, %181 : vector<16x128xf32>
    %cst_70 = arith.constant 0.0805374458 : f32
    %188 = vector.broadcast %cst_70 : f32 to vector<16x128xf32>
    %189 = arith.mulf %188, %187 : vector<16x128xf32>
    %cst_71 = arith.constant 0.138776854 : f32
    %190 = vector.broadcast %cst_71 : f32 to vector<16x128xf32>
    %191 = arith.subf %189, %190 : vector<16x128xf32>
    %192 = arith.mulf %191, %187 : vector<16x128xf32>
    %cst_72 = arith.constant 0.199777111 : f32
    %193 = vector.broadcast %cst_72 : f32 to vector<16x128xf32>
    %194 = arith.addf %192, %193 : vector<16x128xf32>
    %195 = arith.mulf %194, %187 : vector<16x128xf32>
    %cst_73 = arith.constant 0.333329499 : f32
    %196 = vector.broadcast %cst_73 : f32 to vector<16x128xf32>
    %197 = arith.subf %195, %196 : vector<16x128xf32>
    %198 = arith.mulf %197, %187 : vector<16x128xf32>
    %199 = arith.mulf %198, %181 : vector<16x128xf32>
    %200 = arith.addf %199, %181 : vector<16x128xf32>
    %201 = arith.addf %186, %200 : vector<16x128xf32>
    %cst_74 = arith.constant 0.000000e+00 : f32
    %202 = vector.broadcast %cst_74 : f32 to vector<16x128xf32>
    %203 = arith.cmpf olt, %161, %202 : vector<16x128xf32>
    %cst_75 = arith.constant 0.000000e+00 : f32
    %204 = vector.broadcast %cst_75 : f32 to vector<16x128xf32>
    %205 = arith.subf %204, %201 : vector<16x128xf32>
    %206 = arith.select %203, %205, %201 : vector<16x128xi1>, vector<16x128xf32>
    %207 = arith.subf %157, %206 : vector<16x128xf32>
    %208 = arith.mulf %207, %207 : vector<16x128xf32>
    %cst_76 = arith.constant 0.405284733 : f32
    %209 = vector.broadcast %cst_76 : f32 to vector<16x128xf32>
    %210 = arith.mulf %209, %208 : vector<16x128xf32>
    %cst_77 = arith.constant 1.000000e+00 : f32
    %211 = vector.broadcast %cst_77 : f32 to vector<16x128xf32>
    %212 = arith.subf %211, %94 : vector<16x128xf32>
    %213 = arith.addf %212, %210 : vector<16x128xf32>
    %cst_78 = arith.constant 1.000000e-07 : f32
    %214 = vector.broadcast %cst_78 : f32 to vector<16x128xf32>
    %215 = arith.addf %213, %214 : vector<16x128xf32>
    %216 = tpu.reciprocal %215 {approx = true} : vector<16x128xf32> -> vector<16x128xf32>
    %217 = arith.mulf %210, %216 : vector<16x128xf32>
    %cst_79 = arith.constant 1.000000e+00 : f32
    %218 = vector.broadcast %cst_79 : f32 to vector<16x128xf32>
    %219 = arith.subf %218, %94 : vector<16x128xf32>
    %cst_80 = arith.constant 1.000000e-07 : f32
    %220 = vector.broadcast %cst_80 : f32 to vector<16x128xf32>
    %221 = arith.addf %108, %220 : vector<16x128xf32>
    %222 = tpu.reciprocal %221 {approx = true} : vector<16x128xf32> -> vector<16x128xf32>
    %223 = arith.mulf %99, %222 : vector<16x128xf32>
    %224 = arith.addf %219, %223 : vector<16x128xf32>
    %225 = arith.mulf %217, %210 : vector<16x128xf32>
    %226 = arith.addf %224, %225 : vector<16x128xf32>
    %227 = arith.mulf %226, %31 : vector<16x128xf32>
    %cst_81 = arith.constant 0.000000e+00 : f32
    %228 = vector.broadcast %cst_81 : f32 to vector<16x128xf32>
    %229 = arith.cmpf ogt, %9, %228 : vector<16x128xf32>
    %cst_82 = arith.constant 1.000000e+00 : f32
    %cst_83 = arith.constant 0.000000e+00 : f32
    %230 = vector.broadcast %cst_82 : f32 to vector<16x128xf32>
    %231 = vector.broadcast %cst_83 : f32 to vector<16x128xf32>
    %232 = arith.select %229, %230, %231 : vector<16x128xi1>, vector<16x128xf32>
    %cst_84 = arith.constant 0.000000e+00 : f32
    %233 = vector.broadcast %cst_84 : f32 to vector<16x128xf32>
    %234 = arith.maximumf %19, %233 : vector<16x128xf32>
    %235 = arith.mulf %19, %232 : vector<16x128xf32>
    %236 = arith.subf %234, %235 : vector<16x128xf32>
    %237 = math.absf %19 : vector<16x128xf32>
    %cst_85 = arith.constant 0.000000e+00 : f32
    %238 = vector.broadcast %cst_85 : f32 to vector<16x128xf32>
    %239 = arith.subf %238, %237 : vector<16x128xf32>
    %240 = math.exp %239 : vector<16x128xf32>
    %cst_86 = arith.constant 1.000000e+00 : f32
    %241 = vector.broadcast %cst_86 : f32 to vector<16x128xf32>
    %242 = arith.addf %241, %240 : vector<16x128xf32>
    %243 = math.log %242 : vector<16x128xf32>
    %244 = arith.addf %236, %243 : vector<16x128xf32>
    %245 = arith.mulf %244, %232 : vector<16x128xf32>
    %cst_87 = arith.constant 0.000000e+00 : f32
    %246 = vector.broadcast %cst_87 : f32 to vector<16x128xf32>
    %247 = arith.maximumf %9, %246 : vector<16x128xf32>
    %248 = math.floor %247 : vector<16x128xf32>
    %249 = arith.fptosi %248 : vector<16x128xf32> to vector<16x128xi32>
    %cst_88 = arith.constant 0.000000e+00 : f32
    %250 = vector.broadcast %cst_88 : f32 to vector<16x128xf32>
    %c5 = arith.constant 5 : index
    %c0_89 = arith.constant 0 : index
    %c0_90 = arith.constant 0 : index
    %251 = vector.load %arg1[%c5, %c0_89, %c0_90] : memref<7x16x128xf32, #tpu.memory_space<vmem>>, vector<1x16x128xf32>
    %252 = vector.shape_cast %251 : vector<1x16x128xf32> to vector<16x128xf32>
    %c1_i32 = arith.constant 1 : i32
    %253 = vector.broadcast %c1_i32 : i32 to vector<16x128xi32>
    %254 = arith.cmpi eq, %249, %253 : vector<16x128xi32>
    %cst_91 = arith.constant 1.000000e+00 : f32
    %cst_92 = arith.constant 0.000000e+00 : f32
    %255 = vector.broadcast %cst_91 : f32 to vector<16x128xf32>
    %256 = vector.broadcast %cst_92 : f32 to vector<16x128xf32>
    %257 = arith.select %254, %255, %256 : vector<16x128xi1>, vector<16x128xf32>
    %cst_93 = arith.constant 0.000000e+00 : f32
    %258 = vector.broadcast %cst_93 : f32 to vector<16x128xf32>
    %259 = arith.maximumf %252, %258 : vector<16x128xf32>
    %260 = arith.mulf %252, %257 : vector<16x128xf32>
    %261 = arith.subf %259, %260 : vector<16x128xf32>
    %262 = math.absf %252 : vector<16x128xf32>
    %cst_94 = arith.constant 0.000000e+00 : f32
    %263 = vector.broadcast %cst_94 : f32 to vector<16x128xf32>
    %264 = arith.subf %263, %262 : vector<16x128xf32>
    %265 = math.exp %264 : vector<16x128xf32>
    %cst_95 = arith.constant 1.000000e+00 : f32
    %266 = vector.broadcast %cst_95 : f32 to vector<16x128xf32>
    %267 = arith.addf %266, %265 : vector<16x128xf32>
    %268 = math.log %267 : vector<16x128xf32>
    %269 = arith.addf %261, %268 : vector<16x128xf32>
    %270 = arith.addf %250, %269 : vector<16x128xf32>
    %c6 = arith.constant 6 : index
    %c0_96 = arith.constant 0 : index
    %c0_97 = arith.constant 0 : index
    %271 = vector.load %arg1[%c6, %c0_96, %c0_97] : memref<7x16x128xf32, #tpu.memory_space<vmem>>, vector<1x16x128xf32>
    %272 = vector.shape_cast %271 : vector<1x16x128xf32> to vector<16x128xf32>
    %c2_i32 = arith.constant 2 : i32
    %273 = vector.broadcast %c2_i32 : i32 to vector<16x128xi32>
    %274 = arith.cmpi eq, %249, %273 : vector<16x128xi32>
    %cst_98 = arith.constant 1.000000e+00 : f32
    %cst_99 = arith.constant 0.000000e+00 : f32
    %275 = vector.broadcast %cst_98 : f32 to vector<16x128xf32>
    %276 = vector.broadcast %cst_99 : f32 to vector<16x128xf32>
    %277 = arith.select %274, %275, %276 : vector<16x128xi1>, vector<16x128xf32>
    %cst_100 = arith.constant 0.000000e+00 : f32
    %278 = vector.broadcast %cst_100 : f32 to vector<16x128xf32>
    %279 = arith.maximumf %272, %278 : vector<16x128xf32>
    %280 = arith.mulf %272, %277 : vector<16x128xf32>
    %281 = arith.subf %279, %280 : vector<16x128xf32>
    %282 = math.absf %272 : vector<16x128xf32>
    %cst_101 = arith.constant 0.000000e+00 : f32
    %283 = vector.broadcast %cst_101 : f32 to vector<16x128xf32>
    %284 = arith.subf %283, %282 : vector<16x128xf32>
    %285 = math.exp %284 : vector<16x128xf32>
    %cst_102 = arith.constant 1.000000e+00 : f32
    %286 = vector.broadcast %cst_102 : f32 to vector<16x128xf32>
    %287 = arith.addf %286, %285 : vector<16x128xf32>
    %288 = math.log %287 : vector<16x128xf32>
    %289 = arith.addf %281, %288 : vector<16x128xf32>
    %290 = arith.addf %270, %289 : vector<16x128xf32>
    %291 = arith.mulf %290, %31 : vector<16x128xf32>
    %c0_i32 = arith.constant 0 : i32
    %292 = vector.broadcast %c0_i32 : i32 to vector<16x128xi32>
    %293 = arith.cmpi sle, %249, %292 : vector<16x128xi32>
    %cst_103 = arith.constant 0.000000e+00 : f32
    %294 = vector.broadcast %cst_103 : f32 to vector<16x128xf32>
    %295 = arith.select %293, %31, %294 : vector<16x128xi1>, vector<16x128xf32>
    %cst_104 = arith.constant dense<0.000000e+00> : vector<128xf32>
    %296 = vector.multi_reduction <add>, %227, %cst_104 [0] : vector<16x128xf32> to vector<128xf32>
    %297 = vector.shape_cast %296 : vector<128xf32> to vector<1x128xf32>
    %cst_105 = arith.constant dense<0.000000e+00> : vector<128xf32>
    %298 = vector.multi_reduction <add>, %245, %cst_105 [0] : vector<16x128xf32> to vector<128xf32>
    %299 = vector.shape_cast %298 : vector<128xf32> to vector<1x128xf32>
    %cst_106 = arith.constant dense<0.000000e+00> : vector<128xf32>
    %300 = vector.multi_reduction <add>, %291, %cst_106 [0] : vector<16x128xf32> to vector<128xf32>
    %301 = vector.shape_cast %300 : vector<128xf32> to vector<1x128xf32>
    %cst_107 = arith.constant dense<0.000000e+00> : vector<128xf32>
    %302 = vector.multi_reduction <add>, %295, %cst_107 [0] : vector<16x128xf32> to vector<128xf32>
    %303 = vector.shape_cast %302 : vector<128xf32> to vector<1x128xf32>
    %304 = tpu.concatenate %297, %299, %301, %303 in 0 : vector<1x128xf32>, vector<1x128xf32>, vector<1x128xf32>, vector<1x128xf32> -> vector<4x128xf32>
    %c0_108 = arith.constant 0 : index
    %c0_109 = arith.constant 0 : index
    %c0_110 = arith.constant 0 : index
    %305 = vector.load %arg3[%c0_108, %c0_109, %c0_110] : memref<1x4x128xf32, #tpu.memory_space<vmem>>, vector<1x4x128xf32>
    %306 = vector.shape_cast %305 : vector<1x4x128xf32> to vector<4x128xf32>
    %307 = vector.shape_cast %304 : vector<4x128xf32> to vector<1x4x128xf32>
    tpu.vector_store %arg3[%c0_108, %c0_109, %c0_110], %307 {strides = array<i32>} : memref<1x4x128xf32, #tpu.memory_space<vmem>>, vector<1x4x128xf32>,
    return
  }
  func.func @transform_0(%arg0: i32) -> (i32, i32, i32) {
    %c0_i32 = arith.constant 0 : i32
    %c0_i32_0 = arith.constant 0 : i32
    %c0_i32_1 = arith.constant 0 : i32
    return %c0_i32, %arg0, %c0_i32_0 : i32, i32, i32
  }
  func.func @transform_1(%arg0: i32) -> (i32, i32, i32) {
    %c0_i32 = arith.constant 0 : i32
    %c0_i32_0 = arith.constant 0 : i32
    %c0_i32_1 = arith.constant 0 : i32
    return %c0_i32, %arg0, %c0_i32_0 : i32, i32, i32
  }
  func.func @transform_2(%arg0: i32) -> (i32, i32, i32) {
    %c0_i32 = arith.constant 0 : i32
    %c0_i32_0 = arith.constant 0 : i32
    %c0_i32_1 = arith.constant 0 : i32
    return %arg0, %c0_i32, %c0_i32_0 : i32, i32, i32
  }
}

</mosaic_0001>

<bundles_post_ra>
// kernel: tpu_custom_call.1
= control target key start
LH: loop header
LB: loop body
LE: loop exit
PB: predicated region body
PF: predicated region fallthrough
CT: control target
= control target key end

     0   :  { %7 = vsyncpa [#allocation3], 0  ;;  %s1139_s0 = inlined_call_operand.hbm [shape: f32[7,16,128], index: 0, kind: input, shape index: {}]   ;;  %s1140_s1 = inlined_call_operand.hbm [shape: f32[5,16,128], index: 1, kind: input, shape index: {}]   ;;  %s1141_s2 = inlined_call_operand.hbm [shape: f32[1,4,128], index: 2, kind: output, shape index: {}]  }
   0x1   :  { %8 = vsyncpa [#allocation6], 0 }
   0x2   :  { %9 = vsyncpa [#allocation4], 0  ;;  %s665_s9 = smov [#allocation2]  }
   0x3   :  { %s15_s10 = sshll.u32 %s665_s9, 4  ;;  %s16_s10 = int_to_ptr.vmem [resolvable:$true] %s15_s10 }
   0x4   :  { %s607_s11 = scalar_lea.vmem %s16_s10, 1792  ;;  %p612_p1 = scmp.lt.s32.totalorder %s16_s10, %s16_s10 }
   0x5   :  { %p608_p0 = scmp.ne.s32.totalorder %s16_s10, %s607_s11  ;;  %p613_p2 = scmp.lt.s32.totalorder %s607_s11, %s607_s11 }
   0x7   :  { %p614_p3 = por %p613_p2, %p612_p1 }
   0x9   :  { %p615_p4 = pnand %p614_p3, %p608_p0 }
   0xb   :  { %618 = shalt.err (!%p615_p4)
}
   0xc   :  { %s666_s12 = smov 128   ;;  %s667_s13 = smov 8  }
   0xd   :  { %21 = dma.hbm_to_vmem [thread:$0]  %s1139_s0, 1792, %s16_s10, [#allocation3], %s666_s12, %s666_s12, %s667_s13  }
   0xe   :  { %s668_s16 = smov [#allocation5]  }
   0xf   :  { %s27_s17 = sshll.u32 %s668_s16, 4  ;;  %s28_s17 = int_to_ptr.vmem [resolvable:$true] %s27_s17 }
  0x10   :  { %s627_s18 = scalar_lea.vmem %s28_s17, 1280  ;;  %p632_p6 = scmp.lt.s32.totalorder %s28_s17, %s28_s17 }
  0x11   :  { %p628_p5 = scmp.ne.s32.totalorder %s28_s17, %s627_s18  ;;  %p633_p7 = scmp.lt.s32.totalorder %s627_s18, %s627_s18 }
  0x13   :  { %p634_p8 = por %p633_p7, %p632_p6 }
  0x15   :  { %p635_p9 = pnand %p634_p8, %p628_p5 }
  0x17   :  { %638 = shalt.err (!%p635_p9)
}
  0x18   :  { %33 = dma.hbm_to_vmem [thread:$0]  %s1140_s1, 1280, %s28_s17, [#allocation6], %s666_s12, %s666_s12, %s667_s13  }
  0x19   :  { %659 = dma.done.wait [#allocation3], 1792  }
  0x1a   :  { %660 = vsyncadd [#allocation3], 4294965504 }
  0x1b   :  { %661 = dma.done.wait [#allocation6], 1280  }
  0x1c   :  { %662 = vsyncadd [#allocation6], 4294966016  ;;  %v693_v0 = vld [vmem:[#allocation5 + $0x20] sm:$0xff]  ;;  %v695_v1 = vld [vmem:[#allocation5 + $0x28] sm:$0xff]  ;;  %v68_v22 = vlaneseq  ;;  %vm669_vm3 = vmmov 1   ;;  %s671_s0 = smov [#allocation7]  }
  0x1d   :  { %v697_v2 = vld [vmem:[#allocation5] sm:$0xff]  ;;  %v49_v3 = vld [vmem:[#allocation5 + $0x30] sm:$0xff]  ;;  %v50_v4 = vld [vmem:[#allocation5 + $0x38] sm:$0xff]  ;;  %v87_v5 = vmul.f32 0.5, %v693_v0  ;;  %v88_v6 = vmul.f32 0.5, %v695_v1  ;;  %s504_s1 = sshll.u32 %s671_s0, 4  ;;  %s505_s1 = int_to_ptr.vmem [resolvable:$true] %s504_s1 }
  0x1e   :  { %v701_v7 = vld [vmem:[#allocation5 + $0x8] sm:$0xff]  ;;  %v703_v8 = vld [vmem:[#allocation5 + $0x10] sm:$0xff]  ;;  %v705_v9 = vld [vmem:[#allocation5 + $0x18] sm:$0xff]  ;;  %v91_v10 = vmul.f32 0.5, %v49_v3  ;;  %v92_v11 = vmul.f32 0.5, %v50_v4  ;;  %v69_v45 = vshrl.u32 %v68_v22, 7  ;;  %p644_p11 = scmp.lt.s32.totalorder %s505_s1, %s505_s1 }
  0x1f   :  { %1145 = vst [vmem:[#allocation11_spill] sm:$0xff] %v705_v9  ;;  %v707_v12 = vld [vmem:[#allocation2 + $0x20] sm:$0xff]  ;;  %v709_v13 = vld [vmem:[#allocation2 + $0x28] sm:$0xff]  ;;  %v63_v14 = vld [vmem:[#allocation2 + $0x30] sm:$0xff]  ;;  %v720_v23 = vsub.f32 %v697_v2, %v87_v5  ;;  %v723_v24 = vsub.f32 %v701_v7, %v88_v6  ;;  %v734_v29 = vadd.f32 %v87_v5, %v697_v2  ;;  %v737_v30 = vadd.f32 %v88_v6, %v701_v7  ;;  %s639_s21 = scalar_lea.vmem %s505_s1, 64 }
  0x20   :  { %v64_v15 = vld [vmem:[#allocation2 + $0x38] sm:$0xff]  ;;  %v99_v16 = vmul.f32 0.5, %v707_v12  ;;  %v100_v17 = vmul.f32 0.5, %v709_v13  ;;  %v103_v18 = vmul.f32 0.5, %v63_v14  ;;  %v713_v19 = vld [vmem:[#allocation2] sm:$0xff]  ;;  %v715_v20 = vld [vmem:[#allocation2 + $0x8] sm:$0xff]  ;;  %v728_v27 = vsub.f32 %v703_v8, %v91_v10  ;;  %p640_p10 = scmp.ne.s32.totalorder %s505_s1, %s639_s21  ;;  %p645_p12 = scmp.lt.s32.totalorder %s639_s21, %s639_s21 }
  0x21   :  { %v717_v21 = vld [vmem:[#allocation2 + $0x10] sm:$0xff]  ;;  %v104_v25 = vmul.f32 0.5, %v64_v15  ;;  %v725_v26 = vld [vmem:[#allocation2 + $0x18] sm:$0xff]  ;;  %v731_v28 = vsub.f32 %v705_v9, %v92_v11  ;;  %v740_v31 = vadd.f32 %v91_v10, %v703_v8  ;;  %v743_v32 = vadd.f32 %v92_v11, %v705_v9 }
  0x22   :  { %v199_v33 = vadd.f32 1e-07, %v49_v3  ;;  %v200_v34 = vadd.f32 1e-07, %v50_v4  ;;  %v746_v35 = vsub.f32 %v713_v19, %v99_v16  ;;  %v749_v36 = vsub.f32 %v715_v20, %v100_v17  ;;  %p646_p13 = por %p645_p12, %p644_p11 }
  0x23   :  { %v752_v37 = vsub.f32 %v717_v21, %v103_v18  ;;  %v755_v38 = vadd.f32 %v99_v16, %v713_v19  ;;  %v758_v39 = vsub.f32 %v725_v26, %v104_v25  ;;  %v761_v40 = vadd.f32 %v100_v17, %v715_v20 }
  0x24   :  { %539 = vrcp.f32 %v199_v33  ;;  %v265_v41 = vadd.f32 1e-07, %v63_v14  ;;  %v764_v42 = vadd.f32 %v103_v18, %v717_v21  ;;  %v767_v43 = vadd.f32 %v104_v25, %v725_v26  ;;  %p647_p0 = pnand %p646_p13, %p640_p10 }
  0x25   :  { %541 = vrcp.f32 %v200_v34  ;;  %v266_v44 = vadd.f32 1e-07, %v64_v15  ;;  %v111_v46 = vmin.f32 %v734_v29, %v755_v38  ;;  %v113_v47 = vmax.f32 %v720_v23, %v746_v35 }
  0x26   :  { %543 = vrcp.f32 %v265_v41  ;;  %v112_v48 = vmin.f32 %v737_v30, %v761_v40  ;;  %v114_v49 = vmax.f32 %v723_v24, %v749_v36  ;;  %v123_v50 = vmax.f32 %v728_v27, %v752_v37 }
  0x27   :  { %v133_v51 = vsub.f32 %v734_v29, %v720_v23  ;;  %v121_v52 = vmin.f32 %v740_v31, %v764_v42  ;;  %v122_v53 = vmin.f32 %v743_v32, %v767_v43  ;;  %v124_v54 = vmax.f32 %v731_v28, %v758_v39 }
  0x28   :  { %545 = vrcp.f32 %v266_v44  ;;  %v134_v55 = vsub.f32 %v737_v30, %v723_v24  ;;  %v115_v56 = vsub.f32 %v111_v46, %v113_v47  ;;  %v139_v57 = vsub.f32 %v740_v31, %v728_v27 }
  0x29   :  { %v116_v58 = vsub.f32 %v112_v48, %v114_v49  ;;  %v140_v59 = vsub.f32 %v743_v32, %v731_v28  ;;  %v793_v60 = vadd.s32 8, %v69_v45  ;;  %v125_v61 = vsub.f32 %v121_v52, %v123_v50 }
  0x2a   :  { %v126_v62 = vsub.f32 %v122_v53, %v124_v54  ;;  %v135_v63 = vadd.f32 1.0, %v133_v51  ;;  %v136_v3 = vadd.f32 1.0, %v134_v55  ;;  %v147_v4 = vsub.f32 %v755_v38, %v746_v35 }
  0x2b   :  { %v153_v5 = vsub.f32 %v764_v42, %v752_v37  ;;  %v799_v6 = vand.u32 127, %v68_v22  ;;  %v117_v10 = vadd.f32 1.0, %v115_v56  ;;  %v141_v11 = vadd.f32 1.0, %v139_v57 }
  0x2c   :  { %v148_v14 = vsub.f32 %v761_v40, %v749_v36  ;;  %v77_v15 = vmul.u32 128, %v69_v45  ;;  %v118_v16 = vadd.f32 1.0, %v116_v58  ;;  %v142_v17 = vadd.f32 1.0, %v140_v59 }
  0x2d   :  { %v154_v18 = vsub.f32 %v767_v43, %v758_v39  ;;  %v127_v34 = vadd.f32 1.0, %v125_v61  ;;  %v128_v41 = vadd.f32 1.0, %v126_v62  ;;  %v137_v44 = vand.u32 2147483647, %v135_v63 }
  0x2e   :  { %v138_v22 = vand.u32 2147483647, %v136_v3  ;;  %v149_v47 = vadd.f32 1.0, %v147_v4  ;;  %v155_v48 = vadd.f32 1.0, %v153_v5  ;;  %v119_v45 = vmax.f32 %v117_v10, 0.0 }
  0x2f   :  { %v143_v51 = vand.u32 2147483647, %v141_v11  ;;  %v150_v52 = vadd.f32 1.0, %v148_v14  ;;  %v120_v54 = vmax.f32 %v118_v16, 0.0  ;;  %v144_v55 = vand.u32 2147483647, %v142_v17 }
  0x30   :  { %v156_v56 = vadd.f32 1.0, %v154_v18  ;;  %v129_v58 = vmax.f32 %v127_v34, 0.0  ;;  %v130_v59 = vmax.f32 %v128_v41, 0.0  ;;  %v822_v63 = vadd.s32 %v77_v15, %v799_v6  ;;  %v841_v34 = vld [vmem:[#allocation2 + $0x50] sm:$0xff] }
  0x31   :  { %v540_v25 = vpop.eup %539  ;;  %v157_v3 = vand.u32 2147483647, %v155_v48  ;;  %v152_v5 = vand.u32 2147483647, %v150_v52  ;;  %v181_v10 = vmin.f32 %v720_v23, %v746_v35  ;;  %v183_v17 = vmax.f32 %v734_v29, %v755_v38  ;;  %v849_v38 = vld [vmem:[#allocation2 + $0x58] sm:$0xff]  ;;  %v853_v48 = vld [vmem:[#allocation2 + $0x48] sm:$0xff] }
  0x32   :  { %v542_v46 = vpop.eup %541  ;;  %v807_v49 = vmul.f32 %v540_v25, %v693_v0  ;;  %1146 = vst [vmem:[#allocation12_spill] sm:$0xff] %v822_v63  ;;  %v158_v16 = vand.u32 2147483647, %v156_v56  ;;  %v145_v35 = vmul.f32 %v143_v51, %v137_v44  ;;  %v146_v25 = vmul.f32 %v144_v55, %v138_v22 }
  0x33   :  { %v544_v50 = vpop.eup %543  ;;  %v810_v53 = vmul.f32 %v542_v46, %v695_v1  ;;  %v151_v1 = vand.u32 2147483647, %v149_v47  ;;  %v843_v41 = vmul.f32 %v129_v58, %v119_v45  ;;  %v182_v46 = vmin.f32 %v723_v24, %v749_v36  ;;  %v851_v47 = vld [vmem:[#allocation2 + $0x40] sm:$0xff] }
  0x34   :  { %v813_v57 = vand.u32 2147483647, %v807_v49  ;;  %v819_v0 = vmul.f32 %v544_v50, %v707_v12  ;;  %v184_v29 = vmax.f32 %v737_v30, %v761_v40  ;;  %v855_v44 = vmul.f32 %v130_v59, %v120_v54  ;;  %v861_v24 = vld [vmem:[#allocation2 + $0x60] sm:$0xff] }
  0x35   :  { %v816_v61 = vand.u32 2147483647, %v810_v53  ;;  %v546_v62 = vpop.eup %545  ;;  %v160_v22 = vmul.f32 %v158_v16, %v152_v5  ;;  %v187_v50 = vmin.f32 %v728_v27, %v752_v37  ;;  %v188_v45 = vmin.f32 %v731_v28, %v758_v39  ;;  %v869_v27 = vld [vmem:[#allocation2 + $0x68] sm:$0xff] }
  0x36   :  { %v215_v4 = vadd.f32 1e-30, %v813_v57  ;;  %v829_v14 = vmul.f32 %v546_v62, %v709_v13  ;;  %v219_v12 = vadd.f32 1.0, %v813_v57  ;;  %v836_v18 = vand.u32 2147483647, %v819_v0 }
  0x37   :  { %v216_v11 = vadd.f32 1e-30, %v816_v61  ;;  %v220_v15 = vadd.f32 1.0, %v816_v61  ;;  %v159_v13 = vmul.f32 %v157_v3, %v151_v1  ;;  %v185_v36 = vsub.f32 %v181_v10, %v183_v17  ;;  %v53_v17 = vld [vmem:[#allocation5 + $0x48] sm:$0xff] }
  0x38   :  { %547 = vrcp.f32 %v215_v4  ;;  %v839_v23 = vand.u32 2147483647, %v829_v14  ;;  %v281_v30 = vadd.f32 1e-30, %v836_v18  ;;  %v408_v51 = vand.u32 2147483647, %v841_v34 }
  0x39   :  { %549 = vrcp.f32 %v216_v11  ;;  %v161_v52 = vadd.f32 %v159_v13, %v145_v35  ;;  %v285_v54 = vadd.f32 1.0, %v836_v18  ;;  %v409_v56 = vand.u32 2147483647, %v849_v38 }
  0x3a   :  { %551 = vrcp.f32 %v219_v12  ;;  %v282_v40 = vadd.f32 1e-30, %v839_v23  ;;  %v286_v55 = vadd.f32 1.0, %v839_v23  ;;  %v186_v37 = vsub.f32 %v182_v46, %v184_v29 }
  0x3b   :  { %553 = vrcp.f32 %v220_v15  ;;  %v371_v28 = vand.u32 2147483647, %v851_v47  ;;  %v439_v39 = vand.u32 2147483647, %v861_v24  ;;  %v189_v58 = vmax.f32 %v740_v31, %v764_v42 }
  0x3c   :  { %555 = vrcp.f32 %v281_v30  ;;  %v190_v59 = vmax.f32 %v743_v32, %v767_v43  ;;  %v372_v62 = vand.u32 2147483647, %v853_v48  ;;  %vm207_vm0 = vcmp.gt.f32.partialorder %v813_v57, 2.4142137 }
  0x3d   :  { %557 = vrcp.f32 %v282_v40  ;;  %v410_v1 = vsub.f32 0.0, %v408_v51  ;;  %v440_v3 = vand.u32 2147483647, %v869_v27  ;;  %v163_v4 = vsub.f32 %v161_v52, %v843_v41  ;;  %vm888_vm4 = vmxor %vm207_vm0, %vm669_vm3 }
  0x3e   :  { %559 = vrcp.f32 %v285_v54  ;;  %vm208_vm1 = vcmp.gt.f32.partialorder %v816_v61, 2.4142137  ;;  %v411_v5 = vsub.f32 0.0, %v409_v56  ;;  %v162_v10 = vadd.f32 %v160_v22, %v146_v25 }
  0x3f   :  { %561 = vrcp.f32 %v286_v55  ;;  %v882_v31 = vmul.f32 %v185_v36, %v185_v36  ;;  %v373_v42 = vsub.f32 0.0, %v371_v28  ;;  %v441_v32 = vsub.f32 0.0, %v439_v39  ;;  %vm897_vm6 = vmxor %vm208_vm1, %vm669_vm3 }
  0x40   :  { %v191_v43 = vsub.f32 %v187_v50, %v189_v58  ;;  %vm209_vm2 = vcmp.gt.f32.partialorder %v813_v57, 0.41421357  ;;  %v516_v16 = vadd.f32 -1.0, %v813_v57  ;;  %v374_v12 = vsub.f32 0.0, %v372_v62 }
  0x41   :  { %vm210_vm5 = vcmp.gt.f32.partialorder %v816_v61, 0.41421357  ;;  %v517_v35 = vadd.f32 -1.0, %v816_v61  ;;  %v412_v25 = vmul.f32 1.442695, %v410_v1  ;;  %v442_v13 = vsub.f32 0.0, %v440_v3  ;;  %vm909_vm7 = vmand %vm209_vm2, %vm888_vm4 }
  0x42   :  { %v165_v29 = vadd.f32 1e-07, %v163_v4  ;;  %v192_v22 = vsub.f32 %v188_v45, %v190_v59  ;;  %v902_v50 = vmul.f32 %v186_v37, %v186_v37  ;;  %v414_v36 = vmul.f32 1.442695, %v411_v5  ;;  %vm917_vm8 = vmand %vm210_vm5, %vm897_vm6  ;;  %v52_v1 = vld [vmem:[#allocation5 + $0x40] sm:$0xff] }
  0x43   :  { %v164_v40 = vsub.f32 %v162_v10, %v855_v44  ;;  %v375_v54 = vmul.f32 1.442695, %v373_v42  ;;  %v443_v55 = vmul.f32 1.442695, %v441_v32  ;;  %vm273_vm9 = vcmp.gt.f32.partialorder %v836_v18, 2.4142137 }
  0x44   :  { %v445_v39 = vmul.f32 1.442695, %v442_v13  ;;  %vm274_vm10 = vcmp.gt.f32.partialorder %v839_v23, 2.4142137  ;;  %v377_v59 = vmul.f32 1.442695, %v374_v12  ;;  %563 = vpow2.f32 %v412_v25  ;;  %vm938_vm13 = vmxor %vm273_vm9, %vm669_vm3 }
  0x45   :  { %v548_v15 = vpop.eup %547  ;;  %vm275_vm11 = vcmp.gt.f32.partialorder %v836_v18, 0.41421357  ;;  %vm276_vm12 = vcmp.gt.f32.partialorder %v839_v23, 0.41421357  ;;  %565 = vpow2.f32 %v414_v36  ;;  %v522_v10 = vadd.f32 -1.0, %v836_v18  ;;  %vm954_vm14 = vmxor %vm274_vm10, %vm669_vm3 }
  0x46   :  { %v550_v46 = vpop.eup %549  ;;  %v223_v52 = vsub.f32 0.0, %v548_v15  ;;  %567 = vpow2.f32 %v443_v55  ;;  %v523_v12 = vadd.f32 -1.0, %v839_v23  ;;  %v195_v25 = vmul.f32 %v191_v43, %v191_v43  ;;  %vm968_vm15 = vmand %vm275_vm11, %vm938_vm13 }
  0x47   :  { %v552_v30 = vpop.eup %551  ;;  %v224_v37 = vsub.f32 0.0, %v550_v46  ;;  %569 = vpow2.f32 %v445_v39  ;;  %v196_v13 = vmul.f32 %v192_v22, %v192_v22  ;;  %vm977_vm2 = vmand %vm276_vm12, %vm954_vm14  ;;  %vm361_vm3 = vcmp.gt.f32.partialorder %v52_v1, 0.0 }
  0x48   :  { %v554_v56 = vpop.eup %553  ;;  %v227_v28 = vmul.f32 %v552_v30, %v516_v16  ;;  %571 = vpow2.f32 %v375_v54  ;;  %vm362_vm4 = vcmp.gt.f32.partialorder %v53_v17, 0.0  ;;  %v197_v5 = vadd.f32 %v195_v25, %v882_v31 }
  0x49   :  { %v228_v58 = vmul.f32 %v554_v56, %v517_v35  ;;  %v556_v42 = vpop.eup %555  ;;  %v166_v35 = vadd.f32 1e-07, %v164_v40  ;;  %v389_v40 = vmax.f32 %v52_v1, 0.0  ;;  %573 = vpow2.f32 %v377_v59 }
  0x4a   :  { %v229_v62 = vsel %vm909_vm7, %v227_v28, %v813_v57  ;;  %v558_v15 = vpop.eup %557  ;;  %v289_v55 = vsub.f32 0.0, %v556_v42  ;;  %575 = vrcp.f32 %v165_v29 }
  0x4b   :  { %v230_v3 = vsel %vm917_vm8, %v228_v58, %v816_v61  ;;  %v933_v4 = vsel %vm207_vm0, %v223_v52, %v229_v62  ;;  %v560_v36 = vpop.eup %559  ;;  %v390_v62 = vmax.f32 %v53_v17, 0.0  ;;  %v391_v31 = vfloor.f32 %v389_v40 }
  0x4c   :  { %v945_v32 = vsel %vm208_vm1, %v224_v37, %v230_v3  ;;  %v949_v11 = vmul.f32 %v933_v4, %v933_v4  ;;  %v562_v43 = vpop.eup %561  ;;  %v290_v37 = vsub.f32 0.0, %v558_v15  ;;  %v293_v28 = vmul.f32 %v560_v36, %v522_v10 }
  0x4d   :  { %v961_v46 = vmul.f32 %v945_v32, %v945_v32  ;;  %v294_v58 = vmul.f32 %v562_v43, %v523_v12  ;;  %v198_v15 = vadd.f32 %v196_v13, %v902_v50  ;;  %577 = vrcp.f32 %v166_v35 }
  0x4e   :  { %v239_v30 = vmul.f32 0.080537446, %v949_v11  ;;  %v295_v3 = vsel %vm968_vm15, %v293_v28, %v836_v18  ;;  %v528_v1 = vtrunc.f32 %v391_v31  ;;  %v403_v52 = vmax.f32 %v849_v38, 0.0 }
  0x4f   :  { %v240_v22 = vmul.f32 0.080537446, %v961_v46  ;;  %v296_v10 = vsel %vm977_vm2, %v294_v58, %v839_v23  ;;  %v991_v59 = vsel %vm273_vm9, %v289_v55, %v295_v3  ;;  %v1045_v61 = vadd.f32 1e-07, %v198_v15 }
  0x50   :  { %v518_v39 = vadd.f32 -0.13877685, %v239_v30  ;;  %v996_v16 = vsel %vm274_vm10, %v290_v37, %v296_v10  ;;  %v1000_v12 = vmul.f32 %v991_v59, %v991_v59  ;;  %v392_v30 = vfloor.f32 %v390_v62 }
  0x51   :  { %v519_v54 = vadd.f32 -0.13877685, %v240_v22  ;;  %v1005_v36 = vmul.f32 %v996_v16, %v996_v16  ;;  %v1143_v22 = vmov 0.0   ;;  %v564_v28 = vpop.eup %563 }
  0x52   :  { %v243_v42 = vmul.f32 %v518_v39, %v949_v11  ;;  %v305_v43 = vmul.f32 0.080537446, %v1000_v12  ;;  %v1010_v37 = vsel %vm361_vm3, 1.0, %v1143_v22  ;;  %v1016_v13 = vsel %vm362_vm4, 1.0, %v1143_v22  ;;  %v566_v35 = vpop.eup %565 }
  0x53   :  { %v244_v29 = vmul.f32 %v519_v54, %v961_v46  ;;  %v306_v50 = vmul.f32 0.080537446, %v1005_v36  ;;  %v568_v3 = vpop.eup %567  ;;  %v233_v17 = vsel %vm909_vm7, 0.7853982, %v1143_v22  ;;  %v416_v9 = vadd.f32 1.0, %v564_v28 }
  0x54   :  { %v245_v25 = vadd.f32 0.19977711, %v243_v42  ;;  %v524_v62 = vadd.f32 -0.13877685, %v305_v43  ;;  %v570_v33 = vpop.eup %569  ;;  %v1033_v54 = vcvt.f32.s32 %v528_v1  ;;  %v447_v51 = vadd.f32 1.0, %v568_v3 }
  0x55   :  { %v246_v55 = vadd.f32 0.19977711, %v244_v29  ;;  %v525_v10 = vadd.f32 -0.13877685, %v306_v50  ;;  %v1021_v29 = vadd.f32 1e-07, %v197_v5  ;;  %579 = vlog2.f32 %v416_v9 }
  0x56   :  { %v247_v40 = vmul.f32 %v245_v25, %v949_v11  ;;  %v530_v25 = vtrunc.f32 %v392_v30  ;;  %v309_v39 = vmul.f32 %v524_v62, %v1000_v12  ;;  %v417_v5 = vadd.f32 1.0, %v566_v35 }
  0x57   :  { %v248_v58 = vmul.f32 %v246_v55, %v961_v46  ;;  %v234_v55 = vsel %vm917_vm8, 0.7853982, %v1143_v22  ;;  %v310_v43 = vmul.f32 %v525_v10, %v1005_v36  ;;  %v235_v28 = vsel %vm207_vm0, 1.5707964, %v233_v17 }
  0x58   :  { %v520_v42 = vadd.f32 -0.3333295, %v247_v40  ;;  %v572_v40 = vpop.eup %571  ;;  %v311_v50 = vadd.f32 0.19977711, %v309_v39  ;;  %v448_v22 = vadd.f32 1.0, %v570_v33  ;;  %581 = vlog2.f32 %v417_v5 }
  0x59   :  { %v521_v63 = vadd.f32 -0.3333295, %v248_v58  ;;  %v574_v58 = vpop.eup %573  ;;  %v312_v45 = vadd.f32 0.19977711, %v310_v43  ;;  %v379_v1 = vadd.f32 1.0, %v572_v40  ;;  %583 = vlog2.f32 %v447_v51 }
  0x5a   :  { %v251_v31 = vmul.f32 %v520_v42, %v949_v11  ;;  %v236_v11 = vsel %vm208_vm1, 1.5707964, %v234_v55  ;;  %v313_v42 = vmul.f32 %v311_v50, %v1000_v12  ;;  %v380_v10 = vadd.f32 1.0, %v574_v58 }
  0x5b   :  { %v252_v30 = vmul.f32 %v521_v63, %v961_v46  ;;  %v576_v63 = vpop.eup %575  ;;  %v314_v39 = vmul.f32 %v312_v45, %v1005_v36  ;;  %v1047_v17 = vcvt.f32.s32 %v530_v25  ;;  %585 = vlog2.f32 %v448_v22 }
  0x5c   :  { %v253_v62 = vmul.f32 %v251_v31, %v933_v4  ;;  %v526_v3 = vadd.f32 -0.3333295, %v313_v42  ;;  %v1163_v9 = vmov 0.0   ;;  %v402_v43 = vmax.f32 %v841_v34, 0.0  ;;  %v578_v5 = vpop.eup %577 }
  0x5d   :  { %v254_v35 = vmul.f32 %v252_v30, %v945_v32  ;;  %v527_v33 = vadd.f32 -0.3333295, %v314_v39  ;;  %v300_v40 = vsel %vm977_vm2, 0.7853982, %v1163_v9  ;;  %587 = vlog2.f32 %v379_v1 }
  0x5e   :  { %v255_v46 = vadd.f32 %v253_v62, %v933_v4  ;;  %v299_v4 = vsel %vm968_vm15, 0.7853982, %v1163_v9  ;;  %v317_v31 = vmul.f32 %v526_v3, %v1000_v12  ;;  %589 = vlog2.f32 %v380_v10 }
  0x5f   :  { %v256_v57 = vadd.f32 %v254_v35, %v945_v32  ;;  %v318_v15 = vmul.f32 %v527_v33, %v1005_v36  ;;  %vm398_vm0 = vcmp.eq.s32.totalorder %v1033_v54, 1  ;;  %vm259_vm1 = vcmp.lt.f32.partialorder %v807_v49, 0.0 }
  0x60   :  { %v257_v55 = vadd.f32 %v255_v46, %v235_v28  ;;  %v319_v22 = vmul.f32 %v317_v31, %v991_v59  ;;  %v301_v12 = vsel %vm273_vm9, 1.5707964, %v299_v4  ;;  %vm399_vm5 = vcmp.eq.s32.totalorder %v1047_v17, 1 }
  0x61   :  { %v258_v32 = vadd.f32 %v256_v57, %v236_v11  ;;  %v320_v25 = vmul.f32 %v318_v15, %v996_v16  ;;  %v302_v36 = vsel %vm274_vm10, 1.5707964, %v300_v40  ;;  %vm429_vm6 = vcmp.eq.s32.totalorder %v1033_v54, 2 }
  0x62   :  { %v261_v56 = vsub.f32 0.0, %v257_v55  ;;  %v321_v30 = vadd.f32 %v319_v22, %v991_v59  ;;  %v400_v58 = vsel %vm398_vm0, 1.0, %v1163_v9  ;;  %vm430_vm7 = vcmp.eq.s32.totalorder %v1047_v17, 2 }
  0x63   :  { %v262_v50 = vsub.f32 0.0, %v258_v32  ;;  %v322_v51 = vadd.f32 %v320_v25, %v996_v16  ;;  %v1074_v18 = vmul.f32 %v576_v63, %v843_v41  ;;  %vm260_vm8 = vcmp.lt.f32.partialorder %v810_v53, 0.0  ;;  %v580_v53 = vpop.eup %579 }
  0x64   :  { %v323_v28 = vadd.f32 %v321_v30, %v301_v12  ;;  %v401_v23 = vsel %vm399_vm5, 1.0, %v1163_v9  ;;  %v1079_v62 = vmul.f32 %v578_v5, %v855_v44  ;;  %vm325_vm9 = vcmp.lt.f32.partialorder %v819_v0, 0.0 }
  0x65   :  { %v324_v59 = vadd.f32 %v322_v51, %v302_v36  ;;  %v431_v16 = vsel %vm429_vm6, 1.0, %v1163_v9  ;;  %v263_v45 = vsel %vm259_vm1, %v261_v56, %v257_v55  ;;  %vm326_vm10 = vcmp.lt.f32.partialorder %v829_v14, 0.0  ;;  %v582_v46 = vpop.eup %581 }
  0x66   :  { %v327_v41 = vsub.f32 0.0, %v323_v28  ;;  %v432_v11 = vsel %vm430_vm7, 1.0, %v1163_v9  ;;  %v264_v35 = vsel %vm260_vm8, %v262_v50, %v258_v32  ;;  %v404_v63 = vmul.f32 %v400_v58, %v841_v34  ;;  %v584_v14 = vpop.eup %583 }
  0x67   :  { %v328_v42 = vsub.f32 0.0, %v324_v59  ;;  %v405_v44 = vmul.f32 %v401_v23, %v849_v38  ;;  %v367_v0 = vmul.f32 %v1010_v37, %v851_v47  ;;  %v433_v49 = vmax.f32 %v861_v24, 0.0 }
  0x68   :  { %v329_v39 = vsel %vm325_vm9, %v327_v41, %v323_v28  ;;  %v435_v1 = vmul.f32 %v431_v16, %v861_v24  ;;  %v434_v10 = vmax.f32 %v869_v27, 0.0  ;;  %v436_v33 = vmul.f32 %v432_v11, %v869_v27  ;;  %v586_v55 = vpop.eup %585 }
  0x69   :  { %v330_v57 = vsel %vm326_vm10, %v328_v42, %v324_v59  ;;  %v331_v3 = vsub.f32 %v263_v45, %v329_v39  ;;  %v337_v38 = vsub.f32 1.0, %v1074_v18  ;;  %591 = vrcp.f32 %v1021_v29  ;;  %v1168_v42 = vld [vmem:[#allocation12_spill] sm:$0xff] }
  0x6a   :  { %v332_v34 = vsub.f32 %v264_v35, %v330_v57  ;;  %v368_v4 = vmul.f32 %v1016_v13, %v853_v48  ;;  %v338_v5 = vsub.f32 1.0, %v1079_v62  ;;  %v406_v24 = vsub.f32 %v402_v43, %v404_v63  ;;  %v588_v40 = vpop.eup %587 }
  0x6b   :  { %v333_v31 = vmul.f32 %v331_v3, %v331_v3  ;;  %v407_v32 = vsub.f32 %v403_v52, %v405_v44  ;;  %v419_v22 = vmul.f32 0.6931472, %v580_v53  ;;  %v421_v12 = vmul.f32 0.6931472, %v582_v46  ;;  %v590_v27 = vpop.eup %589  ;;  %v1167_v53 = vld [vmem:[#allocation11_spill] sm:$0xff] }
  0x6c   :  { %v334_v15 = vmul.f32 %v332_v34, %v332_v34  ;;  %v437_v25 = vsub.f32 %v433_v49, %v435_v1  ;;  %v438_v36 = vsub.f32 %v434_v10, %v436_v33  ;;  %v450_v30 = vmul.f32 0.6931472, %v584_v14 }
  0x6d   :  { %v1100_v56 = vmul.f32 0.40528473, %v333_v31  ;;  %v452_v50 = vmul.f32 0.6931472, %v586_v55  ;;  %v1164_v29 = vmul.u32 128, %v793_v60  ;;  %v171_v58 = vsub.f32 %v697_v2, %v713_v19 }
  0x6e   :  { %v336_v43 = vmul.f32 0.40528473, %v334_v15  ;;  %593 = vrcp.f32 %v1045_v61  ;;  %v175_v52 = vsub.f32 %v703_v8, %v717_v21  ;;  %v1165_v23 = vmax.f32 %v851_v47, 0.0 }
  0x6f   :  { %v80_v51 = vadd.s32 %v1164_v29, %v799_v6  ;;  %v339_v28 = vadd.f32 %v337_v38, %v1100_v56  ;;  %v1166_v16 = vmax.f32 %v853_v48, 0.0  ;;  %v382_v2 = vmul.f32 0.6931472, %v588_v40 }
  0x70   :  { %v369_v59 = vsub.f32 %v1165_v23, %v367_v0  ;;  %v340_v6 = vadd.f32 %v338_v5, %v336_v43  ;;  %v384_v19 = vmul.f32 0.6931472, %v590_v27  ;;  %v422_v45 = vadd.f32 %v419_v22, %v406_v24 }
  0x71   :  { %v370_v60 = vsub.f32 %v1166_v16, %v368_v4  ;;  %v341_v61 = vadd.f32 1e-07, %v339_v28  ;;  %v423_v41 = vadd.f32 %v421_v12, %v407_v32  ;;  %v453_v11 = vadd.f32 %v450_v30, %v437_v25 }
  0x72   :  { %v454_v8 = vadd.f32 %v452_v50, %v438_v36  ;;  %v172_v21 = vsub.f32 %v701_v7, %v715_v20  ;;  %v176_v47 = vsub.f32 %v1167_v53, %v725_v26  ;;  %v342_v35 = vadd.f32 1e-07, %v340_v6 }
  0x73   :  { %vm81_vm11 = vcmp.lt.s32.totalorder %v1168_v42, 128  ;;  %vm82_vm12 = vcmp.lt.s32.totalorder %v80_v51, 128  ;;  %595 = vrcp.f32 %v341_v61  ;;  %v385_v48 = vadd.f32 %v382_v2, %v369_v59 }
  0x74   :  { %597 = vrcp.f32 %v342_v35  ;;  %v386_v63 = vadd.f32 %v384_v19, %v370_v60  ;;  %v173_v44 = vmul.f32 %v171_v58, %v171_v58  ;;  %v177_v46 = vmul.f32 %v175_v52, %v175_v52 }
  0x75   :  { %v455_v39 = vadd.f32 %v453_v11, %v422_v45  ;;  %v456_v0 = vadd.f32 %v454_v8, %v423_v41  ;;  %v514_v49 = vsel %vm81_vm11, 1.0, %v1163_v9  ;;  %v515_v1 = vsel %vm82_vm12, 1.0, %v1163_v9 }
  0x76   :  { %v174_v7 = vmul.f32 %v172_v21, %v172_v21  ;;  %v178_v20 = vmul.f32 %v176_v47, %v176_v47  ;;  %v592_v14 = vpop.eup %591  ;;  %v387_v26 = vmul.f32 %v385_v48, %v1010_v37  ;;  %v388_v57 = vmul.f32 %v386_v63, %v1016_v13 }
  0x77   :  { %vm459_vm13 = vcmp.le.s32.totalorder %v1033_v54, 0  ;;  %vm460_vm14 = vcmp.le.s32.totalorder %v1047_v17, 0  ;;  %v179_v3 = vadd.f32 %v177_v46, %v173_v44  ;;  %v457_v10 = vmul.f32 %v514_v49, %v455_v39 }
  0x78   :  { %v458_v33 = vmul.f32 %v515_v1, %v456_v0  ;;  %v180_v55 = vadd.f32 %v178_v20, %v174_v7  ;;  %v461_v4 = vsel %vm459_vm13, %v514_v49, 0.0  ;;  %v462_v31 = vsel %vm460_vm14, %v515_v1, 0.0 }
  0x79   :  { %v470_v24 = vadd.f32 %v388_v57, %v387_v26  ;;  %v351_v9 = vmul.f32 %v592_v14, %v179_v3  ;;  %v484_v15 = vadd.f32 %v462_v31, %v461_v4  ;;  %vm491_vm15 = vcmask 1040384  }
  0x7a   :  { %v477_v32 = vadd.f32 %v458_v33, %v457_v10  ;;  %vm493_vm2 = vcmask 1041408   ;;  %vm495_vm3 = vcmask 1042432  }
  0x7b   :  { %v594_v34 = vpop.eup %593  ;;  %v471_v37 = vrot.slane %v470_v24, 4  ;;  %v353_v54 = vadd.f32 %v351_v9, %v337_v38  ;;  %v485_v36 = vrot.slane %v484_v15, 4 }
  0x7c   :  { %v352_v40 = vmul.f32 %v594_v34, %v180_v55  ;;  %v478_v17 = vrot.slane %v477_v32, 4 }
  0x7d   :  { %v472_v29 = vadd.f32 %v471_v37, %v470_v24  ;;  %v486_v28 = vadd.f32 %v485_v36, %v484_v15 }
  0x7e   :  { %v354_v27 = vadd.f32 %v352_v40, %v338_v5  ;;  %v479_v58 = vadd.f32 %v478_v17, %v477_v32 }
  0x7f   :  { %v473_v16 = vrot.slane %v472_v29, 2  ;;  %v487_v38 = vrot.slane %v486_v28, 2 }
  0x80   :  { %v596_v22 = vpop.eup %595  ;;  %v480_v60 = vrot.slane %v479_v58, 2 }
  0x81   :  { %v598_v12 = vpop.eup %597  ;;  %v345_v13 = vmul.f32 %v596_v22, %v1100_v56  ;;  %v474_v2 = vadd.f32 %v473_v16, %v472_v29  ;;  %v488_v5 = vadd.f32 %v487_v38, %v486_v28 }
  0x82   :  { %v346_v25 = vmul.f32 %v598_v12, %v336_v43  ;;  %v481_v19 = vadd.f32 %v480_v60, %v479_v58 }
  0x83   :  { %v355_v30 = vmul.f32 %v345_v13, %v1100_v56  ;;  %v475_v61 = vrot.slane %v474_v2, 1  ;;  %v489_v41 = vrot.slane %v488_v5, 1 }
  0x84   :  { %v356_v50 = vmul.f32 %v346_v25, %v336_v43  ;;  %v482_v56 = vrot.slane %v481_v19, 1 }
  0x85   :  { %v357_v51 = vadd.f32 %v355_v30, %v353_v54  ;;  %v476_v8 = vadd.f32 %v475_v61, %v474_v2  ;;  %v490_v47 = vadd.f32 %v489_v41, %v488_v5 }
  0x86   :  { %v358_v52 = vadd.f32 %v356_v50, %v354_v27  ;;  %v483_v21 = vadd.f32 %v482_v56, %v481_v19 }
  0x87   :  { %v359_v23 = vmul.f32 %v514_v49, %v357_v51 }
  0x88   :  { %v360_v59 = vmul.f32 %v515_v1, %v358_v52 }
  0x8a   :  { %v463_v18 = vadd.f32 %v360_v59, %v359_v23 }
  0x8c   :  { %v464_v6 = vrot.slane %v463_v18, 4 }
  0x8e   :  { %v465_v62 = vadd.f32 %v464_v6, %v463_v18 }
  0x90   :  { %v466_v45 = vrot.slane %v465_v62, 2 }
  0x92   :  { %v467_v43 = vadd.f32 %v466_v45, %v465_v62 }
  0x94   :  { %v468_v11 = vrot.slane %v467_v43, 1 }
  0x96   :  { %v469_v53 = vadd.f32 %v468_v11, %v467_v43 }
  0x98   :  { %v492_v35 = vsel %vm491_vm15, %v469_v53, %v476_v8 }
  0x99   :  { %v494_v42 = vsel %vm493_vm2, %v492_v35, %v483_v21 }
  0x9a   :  { %v496_v48 = vsel %vm495_vm3, %v494_v42, %v490_v47 }
  0x9b   :  { %497 = vst [vmem:[#allocation7] sm:$0xf] %v496_v48 }
  0x9c   :  { %650 = shalt.err (!%p647_p0)
}
  0x9d   :  { %507 = dma.vmem_to_hbm [thread:$0]  %s505_s1, 64, %s1141_s2, [#allocation4]  }
  0x9e   :  { %663 = dma.done.wait [#allocation4], 64  }
  0x9f   :  { %664 = vsyncadd [#allocation4], 4294967232 }
  0xa0   :  { %511 = vsyncpa [#allocation3], 1 }
  0xa1   :  { %512 = vsyncpa [#allocation6], 1 }
  0xa2   :  { %513 = vsyncpa [#allocation4], 1 }

</bundles_post_ra>
